<compile_context>
chip_gen: v5e
topology: v5e:2x2
jax: 0.10.0
libtpu: 0.0.40
codegen_flags: <defaults>
</compile_context>

<pallas_src>
import jax
import jax.numpy as jnp
from jax.experimental import pallas as pl
from jax.experimental.pallas import tpu as pltpu

N_EMBD = 64
HIDDEN = 4 * N_EMBD  # 256
SUBLANE = 8


def _round_up(x, m):
    return ((x + m - 1) // m) * m


def expert_kernel(x_ref, w1_ref, b1_ref, w2_ref, b2_ref, o_ref):
    # x_ref:  (tm, n_embd)     f32  (cast to bf16 in-kernel for the MXU)
    # w1_ref: (n_embd, hidden) bf16
    # b1_ref: (1, hidden)      f32
    # w2_ref: (hidden, n_embd) bf16
    # b2_ref: (1, n_embd)      f32
    # o_ref:  (tm, n_embd)     f32  (unpadded output tile)
    x_bf = x_ref[...].astype(jnp.bfloat16)                 # hides under MXU
    h = jnp.dot(x_bf, w1_ref[...], preferred_element_type=jnp.float32)
    h = jnp.maximum(h + b1_ref[...], 0.0)                  # f32 VPU (v5e-safe)
    y = jnp.dot(h.astype(jnp.bfloat16), w2_ref[...],
                preferred_element_type=jnp.float32)        # MXU bf16, f32 acc
    o_ref[...] = (y + b2_ref[...]).astype(o_ref.dtype)


def expert_forward(x, w1, b1, w2, b2, *, tm_max=2048):
    """x: (..., n_embd) float32. Returns same shape (eval-mode dropout = identity)."""
    orig_shape = x.shape
    n_embd = orig_shape[-1]
    hidden = w1.shape[1]

    x2d = x.reshape(-1, n_embd)
    M = x2d.shape[0]

    # Row tiling: pad rows only to a SUBLANE multiple, then choose a tile count
    # that divides the padded row count. Keep >= 2 tiles once there is enough
    # work (>= 1024 rows) so v7x can shard the row axis across both TCs.
    m8 = _round_up(M, SUBLANE)
    n_tiles = max(pl.cdiv(m8, tm_max), 2 if m8 >= 1024 else 1)
    tm = _round_up(pl.cdiv(m8, n_tiles), SUBLANE)
    m_pad = n_tiles * tm

    if m_pad != M:
        x2d = jnp.pad(x2d, ((0, m_pad - M), (0, 0)))  # few rows at most

    # Only the (tiny) weights are cast wrapper-side; x stays f32 in HBM.
    w1_bf = w1.astype(jnp.bfloat16)
    w2_bf = w2.astype(jnp.bfloat16)
    b1_2d = b1.reshape(1, hidden).astype(jnp.float32)
    b2_2d = b2.reshape(1, n_embd).astype(jnp.float32)

    grid = (n_tiles,)

    flops = 2 * m_pad * n_embd * hidden + 2 * m_pad * hidden * n_embd
    bytes_accessed = (
        m_pad * n_embd * 4            # x (f32 in)
        + w1_bf.size * 2 + w2_bf.size * 2
        + b1_2d.size * 4 + b2_2d.size * 4
        + m_pad * n_embd * 4          # out (f32)
    )

    out = pl.pallas_call(
        expert_kernel,
        out_shape=jax.ShapeDtypeStruct((m_pad, n_embd), jnp.float32),
        grid_spec=pl.GridSpec(
            grid=grid,
            in_specs=[
                pl.BlockSpec((tm, n_embd), lambda i: (i, 0)),       # x tile
                pl.BlockSpec((n_embd, hidden), lambda i: (0, 0)),   # W1 (resident)
                pl.BlockSpec((1, hidden), lambda i: (0, 0)),        # b1
                pl.BlockSpec((hidden, n_embd), lambda i: (0, 0)),   # W2 (resident)
                pl.BlockSpec((1, n_embd), lambda i: (0, 0)),        # b2
            ],
            out_specs=pl.BlockSpec((tm, n_embd), lambda i: (i, 0)),
        ),
        compiler_params=pltpu.CompilerParams(
            dimension_semantics=("parallel",),
        ),
        cost_estimate=pl.CostEstimate(
            flops=flops, transcendentals=0, bytes_accessed=bytes_accessed),
    )(x2d, w1_bf, b1_2d, w2_bf, b2_2d)

    # Strip the (small) row padding only if it exists; no column slicing needed.
    if m_pad != M:
        out = out[:M]
    return out.reshape(orig_shape)


def init_params(key, n_embd=N_EMBD):
    """Deterministic init matching PyTorch Linear shapes (stored transposed)."""
    k1, k2, k3, k4 = jax.random.split(key, 4)
    hidden = 4 * n_embd
    # PyTorch default init: U(-1/sqrt(fan_in), 1/sqrt(fan_in))
    lim1 = 1.0 / jnp.sqrt(n_embd)
    lim2 = 1.0 / jnp.sqrt(hidden)
    w1 = jax.random.uniform(k1, (n_embd, hidden), jnp.float32, -lim1, lim1)
    b1 = jax.random.uniform(k2, (hidden,), jnp.float32, -lim1, lim1)
    w2 = jax.random.uniform(k3, (hidden, n_embd), jnp.float32, -lim2, lim2)
    b2 = jax.random.uniform(k4, (n_embd,), jnp.float32, -lim2, lim2)
    return w1, b1, w2, b2


if __name__ == "__main__":
    key = jax.random.PRNGKey(0)
    kx, kp = jax.random.split(key)

    batch, seq = 2, 8
    x = jax.random.normal(kx, (batch, seq, N_EMBD), jnp.float32)
    w1, b1, w2, b2 = init_params(kp)

    out = expert_forward(x, w1, b1, w2, b2)
    out = jax.block_until_ready(out)
    assert out.shape == x.shape

    # Reference 1: bf16-matched pure-JAX path (same dtype policy as kernel).
    xb = x.reshape(-1, N_EMBD).astype(jnp.bfloat16)
    h_ref = jnp.dot(xb, w1.astype(jnp.bfloat16),
                    preferred_element_type=jnp.float32) + b1
    h_ref = jnp.maximum(h_ref, 0.0)
    ref_bf = (jnp.dot(h_ref.astype(jnp.bfloat16), w2.astype(jnp.bfloat16),
                      preferred_element_type=jnp.float32) + b2).reshape(x.shape)
    assert jnp.allclose(out, ref_bf, atol=1e-3, rtol=1e-3)

    # Reference 2: full-f32 reference (loose tolerance for bf16 MXU inputs).
    ref_f32 = jnp.maximum(x @ w1 + b1, 0.0) @ w2 + b2
    assert jnp.allclose(out, ref_f32, atol=5e-2, rtol=5e-2)

    print("KERNEL_OK")
</pallas_src>

<mosaic_0001>
module attributes {stable_mosaic.version = 11 : i64} {
  func.func @expert_kernel(%arg0: i32, %arg1: memref<16x64xf32, #tpu.memory_space<vmem>>, %arg2: memref<64x256xbf16, #tpu.memory_space<vmem>>, %arg3: memref<1x256xf32, #tpu.memory_space<vmem>>, %arg4: memref<256x64xbf16, #tpu.memory_space<vmem>>, %arg5: memref<1x64xf32, #tpu.memory_space<vmem>>, %arg6: memref<16x64xf32, #tpu.memory_space<vmem>>) attributes {dimension_semantics = [#tpu.dimension_semantics<parallel>], iteration_bounds = array<i64: 1>, scalar_prefetch = 0 : i64, scratch_operands = 0 : i64, tpu.core_type = #tpu.core_type<tc>, window_params = [{transform_indices = @transform_0, window_bounds = array<i64: 16, 64>}, {pipeline_mode = #tpu.pipeline_mode<synchronous>, transform_indices = @transform_1, window_bounds = array<i64: 64, 256>}, {pipeline_mode = #tpu.pipeline_mode<synchronous>, transform_indices = @transform_2, window_bounds = array<i64: 1, 256>}, {pipeline_mode = #tpu.pipeline_mode<synchronous>, transform_indices = @transform_3, window_bounds = array<i64: 256, 64>}, {pipeline_mode = #tpu.pipeline_mode<synchronous>, transform_indices = @transform_4, window_bounds = array<i64: 1, 64>}, {transform_indices = @transform_5, window_bounds = array<i64: 16, 64>}]} {
    %c0 = arith.constant 0 : index
    %c0_0 = arith.constant 0 : index
    %0 = vector.load %arg1[%c0, %c0_0] : memref<16x64xf32, #tpu.memory_space<vmem>>, vector<16x64xf32>
    %1 = arith.truncf %0 : vector<16x64xf32> to vector<16x64xbf16>
    %c0_1 = arith.constant 0 : index
    %c0_2 = arith.constant 0 : index
    %2 = vector.load %arg2[%c0_1, %c0_2] : memref<64x256xbf16, #tpu.memory_space<vmem>>, vector<64x256xbf16>
    %cst = arith.constant dense<0.000000e+00> : vector<16x256xf32>
    %3 = tpu.matmul %1, %2, %cst {dimension_numbers = #tpu.dot_dimension_numbers<[1], [0], [0], [1], [0, 0, 1, 1], [], []>} : vector<16x64xbf16>, vector<64x256xbf16>, vector<16x256xf32> -> vector<16x256xf32>
    %c0_3 = arith.constant 0 : index
    %c0_4 = arith.constant 0 : index
    %4 = vector.load %arg3[%c0_3, %c0_4] : memref<1x256xf32, #tpu.memory_space<vmem>>, vector<1x256xf32>
    %5 = vector.broadcast %4 : vector<1x256xf32> to vector<16x256xf32>
    %6 = arith.addf %3, %5 : vector<16x256xf32>
    %cst_5 = arith.constant 0.000000e+00 : f32
    %7 = vector.broadcast %cst_5 : f32 to vector<16x256xf32>
    %8 = arith.maximumf %6, %7 : vector<16x256xf32>
    %9 = arith.truncf %8 : vector<16x256xf32> to vector<16x256xbf16>
    %c0_6 = arith.constant 0 : index
    %c0_7 = arith.constant 0 : index
    %10 = vector.load %arg4[%c0_6, %c0_7] : memref<256x64xbf16, #tpu.memory_space<vmem>>, vector<256x64xbf16>
    %cst_8 = arith.constant dense<0.000000e+00> : vector<16x64xf32>
    %11 = tpu.matmul %9, %10, %cst_8 {dimension_numbers = #tpu.dot_dimension_numbers<[1], [0], [0], [1], [0, 0, 1, 1], [], []>} : vector<16x256xbf16>, vector<256x64xbf16>, vector<16x64xf32> -> vector<16x64xf32>
    %c0_9 = arith.constant 0 : index
    %c0_10 = arith.constant 0 : index
    %12 = vector.load %arg5[%c0_9, %c0_10] : memref<1x64xf32, #tpu.memory_space<vmem>>, vector<1x64xf32>
    %13 = vector.broadcast %12 : vector<1x64xf32> to vector<16x64xf32>
    %14 = arith.addf %11, %13 : vector<16x64xf32>
    %c0_11 = arith.constant 0 : index
    %c0_12 = arith.constant 0 : index
    %15 = vector.load %arg6[%c0_11, %c0_12] : memref<16x64xf32, #tpu.memory_space<vmem>>, vector<16x64xf32>
    tpu.vector_store %arg6[%c0_11, %c0_12], %14 {strides = array<i32>} : memref<16x64xf32, #tpu.memory_space<vmem>>, vector<16x64xf32>,
    return
  }
  func.func @transform_0(%arg0: i32) -> (i32, i32) {
    %c0_i32 = arith.constant 0 : i32
    %c0_i32_0 = arith.constant 0 : i32
    return %arg0, %c0_i32 : i32, i32
  }
  func.func @transform_1(%arg0: i32) -> (i32, i32) {
    %c0_i32 = arith.constant 0 : i32
    %c0_i32_0 = arith.constant 0 : i32
    %c0_i32_1 = arith.constant 0 : i32
    return %c0_i32, %c0_i32_0 : i32, i32
  }
  func.func @transform_2(%arg0: i32) -> (i32, i32) {
    %c0_i32 = arith.constant 0 : i32
    %c0_i32_0 = arith.constant 0 : i32
    %c0_i32_1 = arith.constant 0 : i32
    return %c0_i32, %c0_i32_0 : i32, i32
  }
  func.func @transform_3(%arg0: i32) -> (i32, i32) {
    %c0_i32 = arith.constant 0 : i32
    %c0_i32_0 = arith.constant 0 : i32
    %c0_i32_1 = arith.constant 0 : i32
    return %c0_i32, %c0_i32_0 : i32, i32
  }
  func.func @transform_4(%arg0: i32) -> (i32, i32) {
    %c0_i32 = arith.constant 0 : i32
    %c0_i32_0 = arith.constant 0 : i32
    %c0_i32_1 = arith.constant 0 : i32
    return %c0_i32, %c0_i32_0 : i32, i32
  }
  func.func @transform_5(%arg0: i32) -> (i32, i32) {
    %c0_i32 = arith.constant 0 : i32
    %c0_i32_0 = arith.constant 0 : i32
    return %arg0, %c0_i32 : i32, i32
  }
}

</mosaic_0001>

<bundles_post_ra>
// kernel: tpu_custom_call.1
= control target key start
LH: loop header
LB: loop body
LE: loop exit
PB: predicated region body
PF: predicated region fallthrough
CT: control target
= control target key end

     0   :  { %s597_s0 = inlined_call_operand.vmem [shape: f32[16,64], index: 0, kind: input, shape index: {}]   ;;  %s598_s1 = inlined_call_operand.vmem [shape: bf16[64,256], index: 1, kind: input, shape index: {}]   ;;  %s599_s2 = inlined_call_operand.vmem [shape: f32[1,256], index: 2, kind: input, shape index: {}]   ;;  %s600_s3 = inlined_call_operand.vmem [shape: bf16[256,64], index: 3, kind: input, shape index: {}]   ;;  %s601_s4 = inlined_call_operand.vmem [shape: f32[1,64], index: 4, kind: input, shape index: {}]   ;;  %s602_s5 = inlined_call_operand.hbm [shape: f32[16,64], index: 5, kind: output, shape index: {}]  }
   0x1   :  { %v323_v0 = vld [vmem:[%s598_s1 + $0x30] sm:$0xf]  ;;  %v402_v1 = vld [vmem:[%s598_s1 + $0x34] sm:$0xf0]  ;;  %v401_v2 = vld [vmem:[%s598_s1 + $0x34] sm:$0xf] }
   0x2   :  { %v324_v3 = vor.u32 %v402_v1, %v323_v0  ;;  %v325_v4 = vld [vmem:[%s598_s1 + $0x38] sm:$0xf0]  ;;  %v315_v5 = vld [vmem:[%s598_s1 + $0x20] sm:$0xf]  ;;  %v400_v6 = vld [vmem:[%s598_s1 + $0x24] sm:$0xf0] }
   0x3   :  { %v328_v7 = vor.u32 %v401_v2, %v325_v4  ;;  %v399_v8 = vld [vmem:[%s598_s1 + $0x24] sm:$0xf]  ;;  %v317_v9 = vld [vmem:[%s598_s1 + $0x28] sm:$0xf0]  ;;  %v316_v10 = vor.u32 %v400_v6, %v315_v5  ;;  %v307_v12 = vld [vmem:[%s598_s1 + $0x10] sm:$0xf] }
   0x4   :  { %87 = vmatpush.bf16.msra.mxu0 %v324_v3  ;;  %v320_v11 = vor.u32 %v399_v8, %v317_v9  ;;  %v398_v13 = vld [vmem:[%s598_s1 + $0x14] sm:$0xf0]  ;;  %v397_v14 = vld [vmem:[%s598_s1 + $0x14] sm:$0xf]  ;;  %v309_v15 = vld [vmem:[%s598_s1 + $0x18] sm:$0xf0] }
   0x5   :  { %101 = vmatpush.bf16.msra.mxu1 %v328_v7  ;;  %v410_v16 = vld [vmem:[%s600_s3 + $0x38] sm:$0xff]  ;;  %v308_v18 = vor.u32 %v398_v13, %v307_v12  ;;  %v299_v19 = vld [vmem:[%s598_s1] sm:$0xf]  ;;  %v396_v20 = vld [vmem:[%s598_s1 + $0x4] sm:$0xf0]  ;;  %v312_v21 = vor.u32 %v397_v14, %v309_v15 }
   0x6   :  { %v418_v17 = vld [vmem:[%s600_s3 + $0x78] sm:$0xff]  ;;  %v395_v22 = vld [vmem:[%s598_s1 + $0x4] sm:$0xf]  ;;  %v301_v23 = vld [vmem:[%s598_s1 + $0x8] sm:$0xf0]  ;;  %249 = vmatpush.bf16.msra.mxu2 %v410_v16 }
   0x7   :  { %v409_v24 = vld [vmem:[%s600_s3 + $0x30] sm:$0xff]  ;;  %263 = vmatpush.bf16.msra.mxu3 %v418_v17 }
   0x8   :  { %88 = vmatpush.bf16.msra.mxu0 %v316_v10  ;;  %v417_v25 = vld [vmem:[%s600_s3 + $0x70] sm:$0xff] }
   0x9   :  { %102 = vmatpush.bf16.msra.mxu1 %v320_v11 }
   0xa   :  { %10 = vsyncpa [#allocation3], 0  ;;  %v300_v26 = vor.u32 %v396_v20, %v299_v19  ;;  %v22_v27 = vld [vmem:[%s597_s0] sm:$0xff]  ;;  %v23_v28 = vld [vmem:[%s597_s0 + $0x8] sm:$0xff]  ;;  %v304_v29 = vor.u32 %v395_v22, %v301_v23  ;;  %250 = vmatpush.bf16.msra.mxu2 %v409_v24  ;;  %vm79_vm0 = vcmask 523264   ;;  %s449_s11 = smov [#allocation2]  }
   0xb   :  { %v408_v30 = vld [vmem:[%s600_s3 + $0x28] sm:$0xff]  ;;  %264 = vmatpush.bf16.msra.mxu3 %v417_v25  ;;  %v24_v32 = vpack.c.bf16 %v23_v28, %v22_v27  ;;  %v407_v33 = vld [vmem:[%s600_s3 + $0x20] sm:$0xff]  ;;  %v406_v35 = vld [vmem:[%s600_s3 + $0x18] sm:$0xff]  ;;  %s283_s1 = sshll.u32 %s449_s11, 4  ;;  %s285_s14 = sshll.u32 %s602_s5, 4  ;;  %s284_s1 = int_to_ptr.vmem [resolvable:$true] %s283_s1  ;;  %s286_s14 = int_to_ptr.hbm [resolvable:$true] %s285_s14 }
   0xc   :  { %89 = vmatpush.bf16.msra.mxu0 %v308_v18  ;;  %v416_v31 = vld [vmem:[%s600_s3 + $0x68] sm:$0xff]  ;;  %v415_v34 = vld [vmem:[%s600_s3 + $0x60] sm:$0xff]  ;;  %v414_v36 = vld [vmem:[%s600_s3 + $0x58] sm:$0xff]  ;;  %s451_s15 = smov 8  }
   0xd   :  { %103 = vmatpush.bf16.msra.mxu1 %v312_v21  ;;  %v405_v37 = vld [vmem:[%s600_s3 + $0x10] sm:$0xff]  ;;  %v404_v39 = vld [vmem:[%s600_s3 + $0x8] sm:$0xff]  ;;  %v403_v41 = vld [vmem:[%s600_s3] sm:$0xff] }
   0xe   :  { %251 = vmatpush.bf16.msra.mxu2 %v408_v30  ;;  %v413_v38 = vld [vmem:[%s600_s3 + $0x50] sm:$0xff]  ;;  %v412_v40 = vld [vmem:[%s600_s3 + $0x48] sm:$0xff]  ;;  %v411_v42 = vld [vmem:[%s600_s3 + $0x40] sm:$0xff] }
   0xf   :  { %265 = vmatpush.bf16.msra.mxu3 %v416_v31  ;;  %v33_v43 = vld [vmem:[%s599_s2] sm:$0x3] }
  0x10   :  { %90 = vmatpush.bf16.msra.mxu0 %v300_v26  ;;  %v35_v46 = vperm.slane %v33_v43, 0  ;;  %v36_v47 = vperm.slane %v33_v43, 1  ;;  %v422_v60 = vld [vmem:[%s601_s4] ss:$0 sm:$0xff]  ;;  %s450_s4 = smov 128  }
  0x11   :  { %104 = vmatpush.bf16.msra.mxu1 %v304_v29 }
  0x12   :  { %252 = vmatpush.bf16.msra.mxu2 %v407_v33 }
  0x13   :  { %329 = vmatmul.msk.bf16.vlgmr.msra.gmra.mxu0 %vm79_vm0, %v24_v32  ;;  %266 = vmatpush.bf16.msra.mxu3 %v415_v34 }
  0x14   :  { %330 = vmatmul.msk.bf16.vlgmr.msra.gmra.mxu1 %vm79_vm0, %v24_v32 }
  0x16   :  { %253 = vmatpush.bf16.msra.mxu2 %v406_v35 }
  0x17   :  { %267 = vmatpush.bf16.msra.mxu3 %v414_v36 }
  0x1a   :  { %254 = vmatpush.bf16.msra.mxu2 %v405_v37 }
  0x1b   :  { %268 = vmatpush.bf16.msra.mxu3 %v413_v38 }
  0x1e   :  { %255 = vmatpush.bf16.msra.mxu2 %v404_v39 }
  0x1f   :  { %269 = vmatpush.bf16.msra.mxu3 %v412_v40 }
  0x22   :  { %256 = vmatpush.bf16.msra.mxu2 %v403_v41 }
  0x23   :  { %270 = vmatpush.bf16.msra.mxu3 %v411_v42 }
  0x90   :  { %v92_v44 = vpop.f32.mrf.mxu0 }
  0x91   :  { %v106_v45 = vpop.f32.mrf.mxu1  ;;  %v93_v48 = vadd.f32 %v92_v44, %v35_v46 }
  0x92   :  { %v107_v49 = vadd.f32 %v106_v45, %v36_v47 }
  0x93   :  { %v111_v54 = vmax.f32 %v93_v48, 0.0 }
  0x94   :  { %v112_v56 = vmax.f32 %v107_v49, 0.0 }
  0x98   :  { %v94_v50 = vpop.f32.mrf.mxu0 }
  0x99   :  { %v95_v51 = vadd.f32 %v94_v50, %v35_v46  ;;  %v108_v52 = vpop.f32.mrf.mxu1 }
  0x9a   :  { %v109_v53 = vadd.f32 %v108_v52, %v36_v47 }
  0x9b   :  { %v113_v55 = vmax.f32 %v95_v51, 0.0 }
  0x9c   :  { %v114_v57 = vmax.f32 %v109_v53, 0.0 }
  0x9d   :  { %v115_v58 = vpack.c.bf16 %v113_v55, %v111_v54 }
  0x9e   :  { %v116_v59 = vpack.c.bf16 %v114_v57, %v112_v56 }
  0x9f   :  { %257 = vmatmul.bf16.vlgmr.msra.gmra.mxu2 %v115_v58 }
  0xa0   :  { %271 = vmatmul.bf16.vlgmr.msra.gmra.mxu3 %v116_v59 }
 0x122   :  { %v258_v61 = vpop.f32.mrf.mxu2 }
 0x123   :  { %v259_v62 = vadd.f32 %v422_v60, %v258_v61  ;;  %v272_v63 = vpop.f32.mrf.mxu3 }
 0x125   :  { %v273_v0 = vadd.f32 %v272_v63, %v259_v62 }
 0x127   :  { %277 = vst.msk [vmem:[#allocation2] sm:$0xff] %vm79_vm0, %v273_v0 }
 0x12a   :  { %v260_v1 = vpop.f32.mrf.mxu2 }
 0x12b   :  { %v261_v2 = vadd.f32 %v422_v60, %v260_v1  ;;  %v274_v3 = vpop.f32.mrf.mxu3 }
 0x12d   :  { %v275_v4 = vadd.f32 %v274_v3, %v261_v2 }
 0x12f   :  { %278 = vst.msk [vmem:[#allocation2 + $0x8] sm:$0xff] %vm79_vm0, %v275_v4 }
 0x130   :  { %291 = dma.vmem_to_hbm [thread:$0]  %s284_s1, 256, %s286_s14, [#allocation3], %s450_s4, %s450_s4, %s451_s15  }
 0x131   :  { %447 = dma.done.wait [#allocation3], 256  }
 0x132   :  { %448 = vsyncadd [#allocation3], 4294967040 }
 0x133   :  { %296 = vsyncpa [#allocation3], 1 }

</bundles_post_ra>
